<compile_context>
chip_gen: v5e
topology: v5e:2x2
jax: 0.10.0
libtpu: 0.0.40
codegen_flags: <defaults>
</compile_context>

<pallas_src>
import jax
import jax.numpy as jnp
from jax.experimental import pallas as pl
from jax.experimental.pallas import tpu as pltpu

_INV_SQRT2 = 0.7071067811865476

# Depthwise-branch static config: (param-name suffix, (kh, kw)), in argument order.
_DW_SPECS = [("5", (5, 5)), ("1_7", (1, 7)), ("7_1", (7, 1)),
             ("1_11", (1, 11)), ("11_1", (11, 1)),
             ("1_21", (1, 21)), ("21_1", (21, 1))]


def _erf(z):
    # Abramowitz & Stegun 7.1.26 rational approximation (|err| <= 1.5e-7) of the
    # exact erf used by PyTorch's default nn.GELU (lax.erf lowering in Mosaic is
    # not guaranteed).
    a1, a2, a3, a4, a5 = 0.254829592, -0.284496736, 1.421413741, -1.453152027, 1.061405429
    p = 0.3275911
    s = jnp.where(z < 0.0, -1.0, 1.0)
    az = jnp.abs(z)
    t = 1.0 / (1.0 + p * az)
    poly = ((((a5 * t + a4) * t + a3) * t + a2) * t + a1) * t
    return s * (1.0 - poly * jnp.exp(-az * az))


def _gelu(v):
    return 0.5 * v * (1.0 + _erf(v * _INV_SQRT2))


def _sigmoid(v):
    # exp + reciprocal both route through the EUP slot; approx=False keeps exact
    # sigmoid semantics so the 1e-3 check vs the reference holds with margin.
    return pl.reciprocal(1.0 + jnp.exp(-v), approx=False)


def _pick_group_size(N, C):
    """Images per grid block: smallest divisor of N filling the 8-sublane f32 tile."""
    for nb in range(1, N + 1):
        if N % nb == 0 and nb * C >= 8:
            return nb
    return N


def _make_kernel(C, CI, NB, H, W):
    """Builds the Pallas kernel body (all shapes static Python ints)."""
    HW = H * W
    R = NB * C                    # sublane rows per grid block
    use_mxu = C >= 8              # production channel counts -> 1x1 convs on the MXU

    # Distinct nonzero row / column tap offsets across all depthwise kernels.
    h_offs = sorted({i - kh // 2 for _n, (kh, _kw) in _DW_SPECS for i in range(kh)} - {0})
    w_offs = sorted({j - kw // 2 for _n, (_kh, kw) in _DW_SPECS for j in range(kw)} - {0})

    def lane_shift(v, s):
        # r[:, p] == v[:, p + s] for all in-image positions (np.roll convention;
        # lanes that wrap are removed by the caller's boundary mask).
        if s % HW == 0:
            return v
        return pltpu.roll(v, shift=(-s) % HW, axis=1)

    def kernel(x_ref, conv_w_ref, conv_b_ref,
               fc1_wt_ref, fc1_b_ref, fc2_w_ref, fc2_b_ref, *rest):
        out_ref = rest[-1]
        dw_refs = rest[:-1]

        x = x_ref[...]              # (R, HW)
        conv_w = conv_w_ref[...]    # (R, R) block-diagonal per-image 1x1 weight
        conv_b = conv_b_ref[...]    # (R, 1)

        # ---- hoisted per-lane coordinates + deduplicated boundary masks ------
        pos = jax.lax.broadcasted_iota(jnp.int32, (1, HW), 1)
        if (W & (W - 1)) == 0:
            w_idx = pos & (W - 1)
            h_idx = pos >> (W.bit_length() - 1)
        else:
            w_idx = pos % W
            h_idx = pos // W
        # Single-compare masks (h_idx/w_idx already lie in [0,H)/[0,W)); one per
        # distinct offset, shared by every tap of every depthwise kernel.
        hmask = {d: (h_idx >= -d) if d < 0 else (h_idx < H - d) for d in h_offs}
        wmask = {d: (w_idx >= -d) if d < 0 else (w_idx < W - d) for d in w_offs}

        def conv1x1(v):
            if use_mxu:
                # TODO(synk): feed bf16 operands on v6e/v7x (bf16-native MXU).
                return jnp.dot(conv_w, v, preferred_element_type=jnp.float32) + conv_b
            # Tiny-C path: R rank-1 broadcast MACs on the (R, HW) slab.
            acc = jnp.zeros((R, HW), jnp.float32)
            for r in range(R):
                acc = acc + conv_w[:, r:r + 1] * v[r:r + 1, :]
            return acc + conv_b

        def dwconv(v, w_ref, b_ref, kh, kw):
            # Depthwise (kh, kw) conv, "same" zero padding: lane rolls (XLU slot)
            # + precomputed boundary masks (at most one AND per tap on the VPU).
            ph, pw = kh // 2, kw // 2
            wt = w_ref[...]                                   # (R, kh*kw)
            acc = jnp.zeros((R, HW), jnp.float32)
            for i in range(kh):
                di = i - ph
                for j in range(kw):
                    dj = j - pw
                    shifted = lane_shift(v, di * W + dj)
                    if di == 0 and dj == 0:
                        contrib = shifted
                    else:
                        if di == 0:
                            mask = wmask[dj]
                        elif dj == 0:
                            mask = hmask[di]
                        else:
                            mask = hmask[di] & wmask[dj]
                        contrib = jnp.where(mask, shifted, 0.0)
                    t = i * kw + j
                    tap_w = wt[:, t:t + 1]                    # (R, 1)
                    # TODO(synk): on v6e/v7x run this select+MAC chain in bf16
                    # with f32 accumulation (2x VPU throughput); keep f32 on v5e.
                    acc = acc + tap_w * contrib
            return acc + b_ref[...]

        def channel_attention(v):
            fc1_wt = fc1_wt_ref[...]                          # (C, CI)
            fc1_b = fc1_b_ref[...]                            # (1, CI)
            fc2_w = fc2_w_ref[...]                            # (C, CI)
            fc2_b = fc2_b_ref[...]                            # (C, 1)

            inv_hw = 1.0 / float(HW)
            # Per-image spatial pooling == per-row lane reduction in this layout.
            avg = jnp.sum(v, axis=1, keepdims=True) * inv_hw  # (R, 1)
            mx = jnp.max(v, axis=1, keepdims=True)            # (R, 1)

            def mlp(pooled):                                  # pooled: (C, 1)
                h = jnp.maximum(
                    jnp.sum(fc1_wt * pooled, axis=0, keepdims=True) + fc1_b, 0.0)  # (1, CI)
                o = jnp.sum(fc2_w * h, axis=1, keepdims=True) + fc2_b              # (C, 1)
                return _sigmoid(o)

            gates = []
            for n in range(NB):                               # tiny per-image MLP
                sl = slice(n * C, (n + 1) * C)
                gates.append(mlp(avg[sl, :]) + mlp(mx[sl, :]))
            att = gates[0] if NB == 1 else jnp.concatenate(gates, axis=0)  # (R, 1)
            return v * att

        # inputs = act(conv(inputs)); inputs = ca(inputs)
        v = channel_attention(_gelu(conv1x1(x)))

        dw = {}
        for idx, (name, (kh, kw)) in enumerate(_DW_SPECS):
            dw[name] = (dw_refs[2 * idx], dw_refs[2 * idx + 1], kh, kw)

        def branch(inp, name):
            wr, br, kh_, kw_ = dw[name]
            return dwconv(inp, wr, br, kh_, kw_)

        # Multi-scale depthwise branches; accumulate branch-by-branch to bound
        # live intermediates.
        x_init = branch(v, "5")
        xsum = x_init
        xsum = xsum + branch(branch(x_init, "1_7"), "7_1")
        xsum = xsum + branch(branch(x_init, "1_11"), "11_1")
        xsum = xsum + branch(branch(x_init, "1_21"), "21_1")

        # spatial_att = conv(xsum); out = conv(spatial_att * inputs)
        out_ref[...] = conv1x1(conv1x1(xsum) * v)

    return kernel


def cpca_pallas(x, params):
    N, C, H, W = x.shape
    CI = params["fc1_w"].shape[0]
    HW = H * W
    NB = _pick_group_size(N, C)        # images per grid block (fills 8 sublanes)
    R = NB * C
    G = N // NB

    # Full-sublane layout: (N, C, H, W) -> (N*C, H*W); row r = n*C + c.
    x_slab = x.reshape(N * C, HW).astype(jnp.float32)

    def rep(a):  # replicate a per-channel param across the NB images of a block
        return jnp.tile(a, (NB, 1))

    args = [
        x_slab,
        jnp.kron(jnp.eye(NB, dtype=jnp.float32),
                 params["conv_w"].astype(jnp.float32)),        # (R, R) block-diag
        rep(params["conv_b"].reshape(C, 1)),                   # (R, 1)
        params["fc1_w"].T,                                     # (C, CI)
        params["fc1_b"].reshape(1, CI),
        params["fc2_w"],                                       # (C, CI)
        params["fc2_b"].reshape(C, 1),
    ]
    for name, (kh, kw) in _DW_SPECS:
        args.append(rep(params["w" + name].reshape(C, kh * kw)))  # (R, kh*kw)
        args.append(rep(params["b" + name].reshape(C, 1)))        # (R, 1)

    kernel = _make_kernel(C, CI, NB, H, W)

    slab_spec = pl.BlockSpec((R, HW), lambda i: (i, 0))

    def whole(a):  # grid-invariant weight, fully VMEM-resident
        return pl.BlockSpec(a.shape, lambda i: (0,) * a.ndim)

    out = pl.pallas_call(
        kernel,
        out_shape=jax.ShapeDtypeStruct((N * C, HW), jnp.float32),
        grid=(G,),
        in_specs=[slab_spec] + [whole(a) for a in args[1:]],
        out_specs=slab_spec,
        compiler_params=pltpu.CompilerParams(
            dimension_semantics=("parallel",),
            # TODO(synk): for production shapes re-derive the per-block budget
            # against v7x's 64 MiB physical VMEM (blocks + live temps <= ~48 MiB).
            vmem_limit_bytes=32 * 1024 * 1024),
    )(*args)

    return out.reshape(N, C, H, W)


def _assert_roll_is_np_roll():
    """Unit test: pltpu.roll follows the np.roll shift convention the kernel assumes."""
    def probe(x_ref, o_ref):
        o_ref[...] = pltpu.roll(x_ref[...], shift=3, axis=1)

    x = jnp.tile(jnp.arange(128, dtype=jnp.float32)[None, :], (8, 1))
    y = pl.pallas_call(probe, out_shape=jax.ShapeDtypeStruct((8, 128), jnp.float32))(x)
    if not bool(jnp.array_equal(y, jnp.roll(x, 3, axis=1))):
        raise AssertionError("pltpu.roll does not follow the np.roll shift convention")


def cpca_reference(x, params):
    """Pure-JAX reference of the same forward pass (exact erf GELU)."""
    def conv1x1(v, w, b):
        return jnp.einsum("oc,nchw->nohw", w, v) + b[None, :, None, None]

    def dwconv(v, w, b, kh, kw):
        ph, pw = kh // 2, kw // 2
        vp = jnp.pad(v, ((0, 0), (0, 0), (ph, ph), (pw, pw)))
        H, W = v.shape[2], v.shape[3]
        out = jnp.zeros_like(v)
        for i in range(kh):
            for j in range(kw):
                out = out + vp[:, :, i:i + H, j:j + W] * w[None, :, i, j, None, None]
        return out + b[None, :, None, None]

    def gelu(v):
        return 0.5 * v * (1.0 + jax.scipy.special.erf(v * _INV_SQRT2))

    v = gelu(conv1x1(x, params["conv_w"], params["conv_b"]))
    avg = v.mean(axis=(2, 3))
    mx = v.max(axis=(2, 3))

    def mlp(p):
        h = jnp.maximum(p @ params["fc1_w"].T + params["fc1_b"], 0.0)
        return jax.nn.sigmoid(h @ params["fc2_w"].T + params["fc2_b"])

    att = mlp(avg) + mlp(mx)
    v = v * att[:, :, None, None]

    x_init = dwconv(v, params["w5"], params["b5"], 5, 5)
    x1 = dwconv(dwconv(x_init, params["w1_7"], params["b1_7"], 1, 7),
                params["w7_1"], params["b7_1"], 7, 1)
    x2 = dwconv(dwconv(x_init, params["w1_11"], params["b1_11"], 1, 11),
                params["w11_1"], params["b11_1"], 11, 1)
    x3 = dwconv(dwconv(x_init, params["w1_21"], params["b1_21"], 1, 21),
                params["w21_1"], params["b21_1"], 21, 1)
    xsum = x1 + x2 + x3 + x_init
    spatial_att = conv1x1(xsum, params["conv_w"], params["conv_b"])
    out = spatial_att * v
    out = conv1x1(out, params["conv_w"], params["conv_b"])
    return out


if __name__ == "__main__":
    N, C, H, W = 2, 4, 16, 16          # channels=4, channelAttention_reduce=4 -> CI=1
    CI = max(C // 4, 1)

    keys = iter(jax.random.split(jax.random.PRNGKey(0), 32))

    def init(shape, scale=0.3):
        return jax.random.normal(next(keys), shape, jnp.float32) * scale

    params = {
        "conv_w": init((C, C)),   "conv_b": init((C,), 0.1),
        "fc1_w":  init((CI, C)),  "fc1_b":  init((CI,), 0.1),
        "fc2_w":  init((C, CI)),  "fc2_b":  init((C,), 0.1),
        "w5":     init((C, 5, 5)),   "b5":     init((C,), 0.1),
        "w1_7":   init((C, 1, 7)),   "b1_7":   init((C,), 0.1),
        "w7_1":   init((C, 7, 1)),   "b7_1":   init((C,), 0.1),
        "w1_11":  init((C, 1, 11)),  "b1_11":  init((C,), 0.1),
        "w11_1":  init((C, 11, 1)),  "b11_1":  init((C,), 0.1),
        "w1_21":  init((C, 1, 21)),  "b1_21":  init((C,), 0.1),
        "w21_1":  init((C, 21, 1)),  "b21_1":  init((C,), 0.1),
    }

    x = jax.random.normal(next(keys), (N, C, H, W), jnp.float32)

    _assert_roll_is_np_roll()

    out = jax.block_until_ready(cpca_pallas(x, params))
    ref = jax.block_until_ready(cpca_reference(x, params))

    assert out.shape == (N, C, H, W)
    assert bool(jnp.isfinite(out).all())
    max_err = float(jnp.max(jnp.abs(out - ref)))
    if max_err > 1e-3:
        raise AssertionError(f"Pallas output mismatch vs reference: max abs err {max_err}")
    print("KERNEL_OK")
</pallas_src>

<mosaic_0001>
module attributes {stable_mosaic.version = 11 : i64} {
  func.func @probe(%arg0: memref<8x128xf32, #tpu.memory_space<vmem>>, %arg1: memref<8x128xf32, #tpu.memory_space<vmem>>) attributes {dimension_semantics = [], scalar_prefetch = 0 : i64, scratch_operands = 0 : i64, tpu.core_type = #tpu.core_type<tc>} {
    %c0 = arith.constant 0 : index
    %c0_0 = arith.constant 0 : index
    %0 = vector.load %arg0[%c0, %c0_0] : memref<8x128xf32, #tpu.memory_space<vmem>>, vector<8x128xf32>
    %c3_i32 = arith.constant 3 : i32
    %1 = tpu.dynamic_rotate %0 by %c3_i32 dim 1 : vector<8x128xf32>, i32 -> vector<8x128xf32>
    %c0_1 = arith.constant 0 : index
    %c0_2 = arith.constant 0 : index
    %2 = vector.load %arg1[%c0_1, %c0_2] : memref<8x128xf32, #tpu.memory_space<vmem>>, vector<8x128xf32>
    tpu.vector_store %arg1[%c0_1, %c0_2], %1 {strides = array<i32>} : memref<8x128xf32, #tpu.memory_space<vmem>>, vector<8x128xf32>,
    return
  }
}

</mosaic_0001>

<bundles_post_ra>
// kernel: tpu_custom_call.1
= control target key start
LH: loop header
LB: loop body
LE: loop exit
PB: predicated region body
PF: predicated region fallthrough
CT: control target
= control target key end

     0   :  { %6 = vsyncpa [#allocation3], 0  ;;  %s118_s0 = inlined_call_operand.hbm [shape: f32[8,128], index: 0, kind: input, shape index: {}]   ;;  %s119_s1 = inlined_call_operand.hbm [shape: f32[8,128], index: 1, kind: output, shape index: {}]  }
   0x1   :  { %7 = vsyncpa [#allocation4], 0  ;;  %s13_s8 = sshll.u32 %s118_s0, 4  ;;  %s99_s9 = smov [#allocation2]   ;;  %s14_s8 = int_to_ptr.hbm [resolvable:$true] %s13_s8 }
   0x2   :  { %s15_s10 = sshll.u32 %s99_s9, 4  ;;  %s16_s10 = int_to_ptr.vmem [resolvable:$true] %s15_s10 }
   0x3   :  { %18 = dma.hbm_to_vmem [thread:$0]  %s14_s8, 128, %s16_s10, [#allocation3]  }
   0x4   :  { %95 = dma.done.wait [#allocation3], 128  }
   0x5   :  { %96 = vsyncadd [#allocation3], 4294967168  ;;  %v23_v0 = vld [vmem:[#allocation2] sm:$0xff]  ;;  %s100_s11 = smov 3   ;;  %s101_s12 = smov [#allocation5]  }
   0x6   :  { %24 = vrot.lane.b32.xlu0 %v23_v0, %s100_s11  ;;  %s32_s13 = sshll.u32 %s101_s12, 4  ;;  %s34_s16 = sshll.u32 %s119_s1, 4  ;;  %s33_s13 = int_to_ptr.vmem [resolvable:$true] %s32_s13  ;;  %s35_s16 = int_to_ptr.hbm [resolvable:$true] %s34_s16 }
  0x78   :  { %v25_v1 = vpop.permute.xlu0 %24 }
  0x79   :  { %26 = vst [vmem:[#allocation5] sm:$0xff] %v25_v1 }
  0x7a   :  { %37 = dma.vmem_to_hbm [thread:$0]  %s33_s13, 128, %s35_s16, [#allocation4]  }
  0x7b   :  { %97 = dma.done.wait [#allocation4], 128  }
  0x7c   :  { %98 = vsyncadd [#allocation4], 4294967168 }
  0x7d   :  { %42 = vsyncpa [#allocation3], 1 }
  0x7e   :  { %43 = vsyncpa [#allocation4], 1 }

</bundles_post_ra>
